<compile_context>
chip_gen: v7x
topology: tpu7x:2x2x1
jax: 0.10.0
libtpu: 0.0.40
codegen_flags: <defaults>
</compile_context>

<pallas_src>
import functools

import jax
import jax.numpy as jnp
from jax.experimental import pallas as pl
from jax.experimental.pallas import tpu as pltpu

LN_EPS = 1e-5


def _round_up(x, m):
    return ((x + m - 1) // m) * m


def _mlp2d_kernel(x_ref, avg_ref, gamma_ref, beta_ref, w1_ref, b1_ref,
                  w2_ref, b2_ref, o_ref, *, num_layers, shift):
    """One lane-dense row tile of the full mixer stack.

    Packed layout: each row holds P consecutive tokens side by side on the
    lane axis (P*D == 128 lanes). The Linears are block-diagonal packed
    matmuls; LayerNorm stats come from a block-diagonal averaging matmul.

    x_ref   : (TM, P*D)      packed input tile (f32)
    avg_ref : (P*D, P*D)     block-diag segment-mean matrix (f32, exact 1/D)
    gamma   : (L, P*D)       LayerNorm weight (tiled per packed token)
    beta    : (L, P*D)       LayerNorm bias
    w1      : (L, P*D, P*H)  block-diag first Linear weight (bf16)
    b1      : (L, P*H)       first Linear bias (tiled)
    w2      : (L, P*H, P*D)  block-diag second Linear weight (bf16)
    b2      : (L, P*D)       second Linear bias (tiled)
    o_ref   : (TM, P*D)      packed output tile
    """
    # shift-add fused into the kernel (one VPU op, hidden under DMA/MXU).
    z = x_ref[...].astype(jnp.float32) + shift

    for l in range(num_layers):  # static unroll, L = 2
        # --- LayerNorm per token: segment mean / biased variance via MXU ---
        mu = jnp.dot(z, avg_ref[...], preferred_element_type=jnp.float32)
        d = z - mu
        var = jnp.dot(d * d, avg_ref[...], preferred_element_type=jnp.float32)
        zn = d * jax.lax.rsqrt(var + LN_EPS)
        zn = zn * gamma_ref[l:l + 1, :] + beta_ref[l:l + 1, :]

        # --- Linear(D -> H) + SiLU  (bf16 MXU operands, f32 accumulation) ---
        h = jnp.dot(zn.astype(jnp.bfloat16), w1_ref[l],
                    preferred_element_type=jnp.float32)
        h = h + b1_ref[l:l + 1, :]
        h = h * jax.nn.sigmoid(h)  # SiLU (sigmoid lands on the EUP slot)

        # --- Linear(H -> D) ---
        y = jnp.dot(h.astype(jnp.bfloat16), w2_ref[l],
                    preferred_element_type=jnp.float32)
        y = y + b2_ref[l:l + 1, :]

        # --- residual connection (res_conn=True), kept in f32 ---
        z = z + y

    o_ref[...] = z.astype(o_ref.dtype)


def mlp_2d_forward(x_in, params, *, dim_x0, dim_x1, shift=0.0,
                   max_tile_rows=256):
    """Pallas implementation of MLP_2D.forward (check_dim=True config)."""
    gamma, beta, w1, b1, w2, b2 = params
    nb, d0 = x_in.shape[0], x_in.shape[1]
    D = dim_x0[1] * dim_x1[1]
    L, _, H = w1.shape
    M = nb * d0

    # Pack P tokens per 128-lane row so the HBM slab is lane-dense.
    P = 128 // D if (D < 128 and 128 % D == 0) else 1
    Dp, Hp = P * D, P * H

    # (nb, d0, dx0, dx1) -> (M, D) -> (rows, P*D): row-major reshape = free view.
    x2d = x_in.reshape(M, D).astype(jnp.float32)
    rows = pl.cdiv(M, P)
    if rows * P != M:
        x2d = jnp.pad(x2d, ((0, rows * P - M), (0, 0)))
    xp = x2d.reshape(rows, Dp)

    # Row tile: as large as feasible (fewer grid steps), multiple of 8 sublanes.
    tm = min(max_tile_rows, _round_up(rows, 8))
    rows_p = _round_up(rows, tm)
    if rows_p != rows:
        xp = jnp.pad(xp, ((0, rows_p - rows), (0, 0)))

    # Block-diagonal packed weights, built once (bf16 for MXU-native matmuls).
    eye_p = jnp.eye(P, dtype=jnp.float32)
    w1_bd = jnp.einsum('pq,ldh->lpdqh', eye_p, w1).reshape(L, Dp, Hp)
    w2_bd = jnp.einsum('pq,lhd->lphqd', eye_p, w2).reshape(L, Hp, Dp)
    w1_bd = w1_bd.astype(jnp.bfloat16)
    w2_bd = w2_bd.astype(jnp.bfloat16)
    gamma_p = jnp.tile(gamma.astype(jnp.float32), (1, P))
    beta_p = jnp.tile(beta.astype(jnp.float32), (1, P))
    b1_p = jnp.tile(b1.astype(jnp.float32), (1, P))
    b2_p = jnp.tile(b2.astype(jnp.float32), (1, P))
    # Exact 1/D block-diagonal averaging matrix (f32) for per-token LN stats.
    avg = jnp.einsum('pq,de->pdqe', eye_p,
                     jnp.full((D, D), 1.0 / D, jnp.float32)).reshape(Dp, Dp)

    kernel = functools.partial(_mlp2d_kernel, num_layers=L, shift=float(shift))

    out = pl.pallas_call(
        kernel,
        out_shape=jax.ShapeDtypeStruct((rows_p, Dp), jnp.float32),
        grid_spec=pl.GridSpec(
            grid=(rows_p // tm,),
            in_specs=[
                pl.BlockSpec((tm, Dp), lambda i: (i, 0)),        # packed x tile
                pl.BlockSpec((Dp, Dp), lambda i: (0, 0)),        # LN averaging
                pl.BlockSpec((L, Dp), lambda i: (0, 0)),         # ln gamma
                pl.BlockSpec((L, Dp), lambda i: (0, 0)),         # ln beta
                pl.BlockSpec((L, Dp, Hp), lambda i: (0, 0, 0)),  # w1 (blockdiag)
                pl.BlockSpec((L, Hp), lambda i: (0, 0)),         # b1
                pl.BlockSpec((L, Hp, Dp), lambda i: (0, 0, 0)),  # w2 (blockdiag)
                pl.BlockSpec((L, Dp), lambda i: (0, 0)),         # b2
            ],
            out_specs=pl.BlockSpec((tm, Dp), lambda i: (i, 0)),
        ),
        compiler_params=pltpu.CompilerParams(
            dimension_semantics=("parallel",)),
    )(xp, avg, gamma_p, beta_p, w1_bd, b1_p, w2_bd, b2_p)

    # Undo packing / padding (all free row-major views + cheap slices).
    out = out[:rows].reshape(rows * P, D)[:M]
    return out.reshape(nb, d0, dim_x0[1], dim_x1[1])


def mlp_2d_reference(x_in, params, *, dim_x0, dim_x1, shift=0.0):
    """Pure-JAX f32 reference matching the PyTorch module."""
    gamma, beta, w1, b1, w2, b2 = params
    nb, d0 = x_in.shape[0], x_in.shape[1]
    D = dim_x0[1] * dim_x1[1]
    z = (x_in + shift).reshape(nb * d0, D).astype(jnp.float32)
    for l in range(w1.shape[0]):
        mu = jnp.mean(z, axis=-1, keepdims=True)
        var = jnp.mean((z - mu) ** 2, axis=-1, keepdims=True)
        zn = (z - mu) / jnp.sqrt(var + LN_EPS) * gamma[l] + beta[l]
        h = zn @ w1[l] + b1[l]
        h = h * jax.nn.sigmoid(h)
        y = h @ w2[l] + b2[l]
        z = z + y
    return z.reshape(nb, d0, dim_x0[1], dim_x1[1])


def init_params(key, *, D, H, L):
    """Deterministic synthetic parameters (PyTorch Linear weights stored transposed)."""
    ks = jax.random.split(key, 6)
    gamma = jnp.ones((L, D), jnp.float32) + 0.05 * jax.random.normal(ks[0], (L, D))
    beta = 0.05 * jax.random.normal(ks[1], (L, D), jnp.float32)
    w1 = (jax.random.normal(ks[2], (L, D, H), jnp.float32) / jnp.sqrt(D))
    b1 = 0.02 * jax.random.normal(ks[3], (L, H), jnp.float32)
    w2 = (jax.random.normal(ks[4], (L, H, D), jnp.float32) / jnp.sqrt(H))
    b2 = 0.02 * jax.random.normal(ks[5], (L, D), jnp.float32)
    return gamma, beta, w1, b1, w2, b2


if __name__ == "__main__":
    # small shapes consistent with the module's forward
    dim_x0 = (4, 4)
    dim_x1 = (8, 8)
    nb, d0 = 2, 16
    mlp_ratio, mlp_layers = 4, 2
    D = dim_x0[1] * dim_x1[1]          # 32
    H = D * mlp_ratio                  # 128

    key = jax.random.PRNGKey(0)
    k_x, k_p = jax.random.split(key)
    x_in = jax.random.normal(k_x, (nb, d0, dim_x0[0], dim_x1[0]), jnp.float32)
    params = init_params(k_p, D=D, H=H, L=mlp_layers)
    shift = 0.1

    out = mlp_2d_forward(x_in, params, dim_x0=dim_x0, dim_x1=dim_x1, shift=shift)
    out = jax.block_until_ready(out)

    ref = mlp_2d_reference(x_in, params, dim_x0=dim_x0, dim_x1=dim_x1, shift=shift)
    assert out.shape == (nb, d0, dim_x0[1], dim_x1[1])
    # bf16 MXU operands in the Linears -> tolerance loosened vs the pure-f32
    # reference; LN stats and the residual chain stay f32 so error is bounded.
    assert jnp.allclose(out, ref, atol=5e-2, rtol=5e-2), "mismatch vs reference"

    print("KERNEL_OK")
</pallas_src>

<mosaic_0001>
module attributes {stable_mosaic.version = 11 : i64} {
  func.func @_mlp2d_kernel(%arg0: i32, %arg1: memref<8x128xf32, #tpu.memory_space<vmem>>, %arg2: memref<128x128xf32, #tpu.memory_space<vmem>>, %arg3: memref<2x128xf32, #tpu.memory_space<vmem>>, %arg4: memref<2x128xf32, #tpu.memory_space<vmem>>, %arg5: memref<2x128x512xbf16, #tpu.memory_space<vmem>>, %arg6: memref<2x512xf32, #tpu.memory_space<vmem>>, %arg7: memref<2x512x128xbf16, #tpu.memory_space<vmem>>, %arg8: memref<2x128xf32, #tpu.memory_space<vmem>>, %arg9: memref<8x128xf32, #tpu.memory_space<vmem>>) attributes {dimension_semantics = [#tpu.dimension_semantics<parallel>], iteration_bounds = array<i64: 1>, scalar_prefetch = 0 : i64, scratch_operands = 0 : i64, tpu.core_type = #tpu.core_type<tc>, window_params = [{transform_indices = @transform_0, window_bounds = array<i64: 8, 128>}, {pipeline_mode = #tpu.pipeline_mode<synchronous>, transform_indices = @transform_1, window_bounds = array<i64: 128, 128>}, {pipeline_mode = #tpu.pipeline_mode<synchronous>, transform_indices = @transform_2, window_bounds = array<i64: 2, 128>}, {pipeline_mode = #tpu.pipeline_mode<synchronous>, transform_indices = @transform_3, window_bounds = array<i64: 2, 128>}, {pipeline_mode = #tpu.pipeline_mode<synchronous>, transform_indices = @transform_4, window_bounds = array<i64: 2, 128, 512>}, {pipeline_mode = #tpu.pipeline_mode<synchronous>, transform_indices = @transform_5, window_bounds = array<i64: 2, 512>}, {pipeline_mode = #tpu.pipeline_mode<synchronous>, transform_indices = @transform_6, window_bounds = array<i64: 2, 512, 128>}, {pipeline_mode = #tpu.pipeline_mode<synchronous>, transform_indices = @transform_7, window_bounds = array<i64: 2, 128>}, {transform_indices = @transform_8, window_bounds = array<i64: 8, 128>}]} {
    %c0 = arith.constant 0 : index
    %c0_0 = arith.constant 0 : index
    %0 = vector.load %arg1[%c0, %c0_0] : memref<8x128xf32, #tpu.memory_space<vmem>>, vector<8x128xf32>
    %cst = arith.constant 1.000000e-01 : f32
    %1 = vector.broadcast %cst : f32 to vector<8x128xf32>
    %2 = arith.addf %0, %1 : vector<8x128xf32>
    %c0_1 = arith.constant 0 : index
    %c0_2 = arith.constant 0 : index
    %3 = vector.load %arg2[%c0_1, %c0_2] : memref<128x128xf32, #tpu.memory_space<vmem>>, vector<128x128xf32>
    %cst_3 = arith.constant dense<0.000000e+00> : vector<8x128xf32>
    %4 = tpu.matmul %2, %3, %cst_3 {dimension_numbers = #tpu.dot_dimension_numbers<[1], [0], [0], [1], [0, 0, 1, 1], [], []>} : vector<8x128xf32>, vector<128x128xf32>, vector<8x128xf32> -> vector<8x128xf32>
    %5 = arith.subf %2, %4 : vector<8x128xf32>
    %6 = arith.mulf %5, %5 : vector<8x128xf32>
    %c0_4 = arith.constant 0 : index
    %c0_5 = arith.constant 0 : index
    %7 = vector.load %arg2[%c0_4, %c0_5] : memref<128x128xf32, #tpu.memory_space<vmem>>, vector<128x128xf32>
    %cst_6 = arith.constant dense<0.000000e+00> : vector<8x128xf32>
    %8 = tpu.matmul %6, %7, %cst_6 {dimension_numbers = #tpu.dot_dimension_numbers<[1], [0], [0], [1], [0, 0, 1, 1], [], []>} : vector<8x128xf32>, vector<128x128xf32>, vector<8x128xf32> -> vector<8x128xf32>
    %cst_7 = arith.constant 9.99999974E-6 : f32
    %9 = vector.broadcast %cst_7 : f32 to vector<8x128xf32>
    %10 = arith.addf %8, %9 : vector<8x128xf32>
    %11 = math.rsqrt %10 : vector<8x128xf32>
    %12 = arith.mulf %5, %11 : vector<8x128xf32>
    %c0_8 = arith.constant 0 : index
    %c0_9 = arith.constant 0 : index
    %13 = vector.load %arg3[%c0_8, %c0_9] : memref<2x128xf32, #tpu.memory_space<vmem>>, vector<1x128xf32>
    %14 = vector.broadcast %13 : vector<1x128xf32> to vector<8x128xf32>
    %15 = arith.mulf %12, %14 : vector<8x128xf32>
    %c0_10 = arith.constant 0 : index
    %c0_11 = arith.constant 0 : index
    %16 = vector.load %arg4[%c0_10, %c0_11] : memref<2x128xf32, #tpu.memory_space<vmem>>, vector<1x128xf32>
    %17 = vector.broadcast %16 : vector<1x128xf32> to vector<8x128xf32>
    %18 = arith.addf %15, %17 : vector<8x128xf32>
    %19 = arith.truncf %18 : vector<8x128xf32> to vector<8x128xbf16>
    %c0_12 = arith.constant 0 : index
    %c0_13 = arith.constant 0 : index
    %c0_14 = arith.constant 0 : index
    %20 = vector.load %arg5[%c0_12, %c0_13, %c0_14] : memref<2x128x512xbf16, #tpu.memory_space<vmem>>, vector<1x128x512xbf16>
    %21 = vector.shape_cast %20 : vector<1x128x512xbf16> to vector<128x512xbf16>
    %cst_15 = arith.constant dense<0.000000e+00> : vector<8x512xf32>
    %22 = tpu.matmul %19, %21, %cst_15 {dimension_numbers = #tpu.dot_dimension_numbers<[1], [0], [0], [1], [0, 0, 1, 1], [], []>} : vector<8x128xbf16>, vector<128x512xbf16>, vector<8x512xf32> -> vector<8x512xf32>
    %c0_16 = arith.constant 0 : index
    %c0_17 = arith.constant 0 : index
    %23 = vector.load %arg6[%c0_16, %c0_17] : memref<2x512xf32, #tpu.memory_space<vmem>>, vector<1x512xf32>
    %24 = vector.broadcast %23 : vector<1x512xf32> to vector<8x512xf32>
    %25 = arith.addf %22, %24 : vector<8x512xf32>
    %26 = arith.negf %25 : vector<8x512xf32>
    %27 = math.exp %26 : vector<8x512xf32>
    %cst_18 = arith.constant 1.000000e+00 : f32
    %28 = vector.broadcast %cst_18 : f32 to vector<8x512xf32>
    %29 = arith.addf %28, %27 : vector<8x512xf32>
    %30 = arith.divf %28, %29 : vector<8x512xf32>
    %31 = arith.mulf %25, %30 : vector<8x512xf32>
    %32 = arith.truncf %31 : vector<8x512xf32> to vector<8x512xbf16>
    %c0_19 = arith.constant 0 : index
    %c0_20 = arith.constant 0 : index
    %c0_21 = arith.constant 0 : index
    %33 = vector.load %arg7[%c0_19, %c0_20, %c0_21] : memref<2x512x128xbf16, #tpu.memory_space<vmem>>, vector<1x512x128xbf16>
    %34 = vector.shape_cast %33 : vector<1x512x128xbf16> to vector<512x128xbf16>
    %cst_22 = arith.constant dense<0.000000e+00> : vector<8x128xf32>
    %35 = tpu.matmul %32, %34, %cst_22 {dimension_numbers = #tpu.dot_dimension_numbers<[1], [0], [0], [1], [0, 0, 1, 1], [], []>} : vector<8x512xbf16>, vector<512x128xbf16>, vector<8x128xf32> -> vector<8x128xf32>
    %c0_23 = arith.constant 0 : index
    %c0_24 = arith.constant 0 : index
    %36 = vector.load %arg8[%c0_23, %c0_24] : memref<2x128xf32, #tpu.memory_space<vmem>>, vector<1x128xf32>
    %37 = vector.broadcast %36 : vector<1x128xf32> to vector<8x128xf32>
    %38 = arith.addf %35, %37 : vector<8x128xf32>
    %39 = arith.addf %2, %38 : vector<8x128xf32>
    %c0_25 = arith.constant 0 : index
    %c0_26 = arith.constant 0 : index
    %40 = vector.load %arg2[%c0_25, %c0_26] : memref<128x128xf32, #tpu.memory_space<vmem>>, vector<128x128xf32>
    %cst_27 = arith.constant dense<0.000000e+00> : vector<8x128xf32>
    %41 = tpu.matmul %39, %40, %cst_27 {dimension_numbers = #tpu.dot_dimension_numbers<[1], [0], [0], [1], [0, 0, 1, 1], [], []>} : vector<8x128xf32>, vector<128x128xf32>, vector<8x128xf32> -> vector<8x128xf32>
    %42 = arith.subf %39, %41 : vector<8x128xf32>
    %43 = arith.mulf %42, %42 : vector<8x128xf32>
    %c0_28 = arith.constant 0 : index
    %c0_29 = arith.constant 0 : index
    %44 = vector.load %arg2[%c0_28, %c0_29] : memref<128x128xf32, #tpu.memory_space<vmem>>, vector<128x128xf32>
    %cst_30 = arith.constant dense<0.000000e+00> : vector<8x128xf32>
    %45 = tpu.matmul %43, %44, %cst_30 {dimension_numbers = #tpu.dot_dimension_numbers<[1], [0], [0], [1], [0, 0, 1, 1], [], []>} : vector<8x128xf32>, vector<128x128xf32>, vector<8x128xf32> -> vector<8x128xf32>
    %cst_31 = arith.constant 9.99999974E-6 : f32
    %46 = vector.broadcast %cst_31 : f32 to vector<8x128xf32>
    %47 = arith.addf %45, %46 : vector<8x128xf32>
    %48 = math.rsqrt %47 : vector<8x128xf32>
    %49 = arith.mulf %42, %48 : vector<8x128xf32>
    %c1 = arith.constant 1 : index
    %c0_32 = arith.constant 0 : index
    %50 = vector.load %arg3[%c1, %c0_32] : memref<2x128xf32, #tpu.memory_space<vmem>>, vector<1x128xf32>
    %51 = vector.broadcast %50 : vector<1x128xf32> to vector<8x128xf32>
    %52 = arith.mulf %49, %51 : vector<8x128xf32>
    %c1_33 = arith.constant 1 : index
    %c0_34 = arith.constant 0 : index
    %53 = vector.load %arg4[%c1_33, %c0_34] : memref<2x128xf32, #tpu.memory_space<vmem>>, vector<1x128xf32>
    %54 = vector.broadcast %53 : vector<1x128xf32> to vector<8x128xf32>
    %55 = arith.addf %52, %54 : vector<8x128xf32>
    %56 = arith.truncf %55 : vector<8x128xf32> to vector<8x128xbf16>
    %c1_35 = arith.constant 1 : index
    %c0_36 = arith.constant 0 : index
    %c0_37 = arith.constant 0 : index
    %57 = vector.load %arg5[%c1_35, %c0_36, %c0_37] : memref<2x128x512xbf16, #tpu.memory_space<vmem>>, vector<1x128x512xbf16>
    %58 = vector.shape_cast %57 : vector<1x128x512xbf16> to vector<128x512xbf16>
    %cst_38 = arith.constant dense<0.000000e+00> : vector<8x512xf32>
    %59 = tpu.matmul %56, %58, %cst_38 {dimension_numbers = #tpu.dot_dimension_numbers<[1], [0], [0], [1], [0, 0, 1, 1], [], []>} : vector<8x128xbf16>, vector<128x512xbf16>, vector<8x512xf32> -> vector<8x512xf32>
    %c1_39 = arith.constant 1 : index
    %c0_40 = arith.constant 0 : index
    %60 = vector.load %arg6[%c1_39, %c0_40] : memref<2x512xf32, #tpu.memory_space<vmem>>, vector<1x512xf32>
    %61 = vector.broadcast %60 : vector<1x512xf32> to vector<8x512xf32>
    %62 = arith.addf %59, %61 : vector<8x512xf32>
    %63 = arith.negf %62 : vector<8x512xf32>
    %64 = math.exp %63 : vector<8x512xf32>
    %cst_41 = arith.constant 1.000000e+00 : f32
    %65 = vector.broadcast %cst_41 : f32 to vector<8x512xf32>
    %66 = arith.addf %65, %64 : vector<8x512xf32>
    %67 = arith.divf %65, %66 : vector<8x512xf32>
    %68 = arith.mulf %62, %67 : vector<8x512xf32>
    %69 = arith.truncf %68 : vector<8x512xf32> to vector<8x512xbf16>
    %c1_42 = arith.constant 1 : index
    %c0_43 = arith.constant 0 : index
    %c0_44 = arith.constant 0 : index
    %70 = vector.load %arg7[%c1_42, %c0_43, %c0_44] : memref<2x512x128xbf16, #tpu.memory_space<vmem>>, vector<1x512x128xbf16>
    %71 = vector.shape_cast %70 : vector<1x512x128xbf16> to vector<512x128xbf16>
    %cst_45 = arith.constant dense<0.000000e+00> : vector<8x128xf32>
    %72 = tpu.matmul %69, %71, %cst_45 {dimension_numbers = #tpu.dot_dimension_numbers<[1], [0], [0], [1], [0, 0, 1, 1], [], []>} : vector<8x512xbf16>, vector<512x128xbf16>, vector<8x128xf32> -> vector<8x128xf32>
    %c1_46 = arith.constant 1 : index
    %c0_47 = arith.constant 0 : index
    %73 = vector.load %arg8[%c1_46, %c0_47] : memref<2x128xf32, #tpu.memory_space<vmem>>, vector<1x128xf32>
    %74 = vector.broadcast %73 : vector<1x128xf32> to vector<8x128xf32>
    %75 = arith.addf %72, %74 : vector<8x128xf32>
    %76 = arith.addf %39, %75 : vector<8x128xf32>
    %c0_48 = arith.constant 0 : index
    %c0_49 = arith.constant 0 : index
    %77 = vector.load %arg9[%c0_48, %c0_49] : memref<8x128xf32, #tpu.memory_space<vmem>>, vector<8x128xf32>
    tpu.vector_store %arg9[%c0_48, %c0_49], %76 {strides = array<i32>} : memref<8x128xf32, #tpu.memory_space<vmem>>, vector<8x128xf32>,
    return
  }
  func.func @transform_0(%arg0: i32) -> (i32, i32) {
    %c0_i32 = arith.constant 0 : i32
    %c0_i32_0 = arith.constant 0 : i32
    return %arg0, %c0_i32 : i32, i32
  }
  func.func @transform_1(%arg0: i32) -> (i32, i32) {
    %c0_i32 = arith.constant 0 : i32
    %c0_i32_0 = arith.constant 0 : i32
    %c0_i32_1 = arith.constant 0 : i32
    return %c0_i32, %c0_i32_0 : i32, i32
  }
  func.func @transform_2(%arg0: i32) -> (i32, i32) {
    %c0_i32 = arith.constant 0 : i32
    %c0_i32_0 = arith.constant 0 : i32
    %c0_i32_1 = arith.constant 0 : i32
    return %c0_i32, %c0_i32_0 : i32, i32
  }
  func.func @transform_3(%arg0: i32) -> (i32, i32) {
    %c0_i32 = arith.constant 0 : i32
    %c0_i32_0 = arith.constant 0 : i32
    %c0_i32_1 = arith.constant 0 : i32
    return %c0_i32, %c0_i32_0 : i32, i32
  }
  func.func @transform_4(%arg0: i32) -> (i32, i32, i32) {
    %c0_i32 = arith.constant 0 : i32
    %c0_i32_0 = arith.constant 0 : i32
    %c0_i32_1 = arith.constant 0 : i32
    %c0_i32_2 = arith.constant 0 : i32
    return %c0_i32, %c0_i32_0, %c0_i32_1 : i32, i32, i32
  }
  func.func @transform_5(%arg0: i32) -> (i32, i32) {
    %c0_i32 = arith.constant 0 : i32
    %c0_i32_0 = arith.constant 0 : i32
    %c0_i32_1 = arith.constant 0 : i32
    return %c0_i32, %c0_i32_0 : i32, i32
  }
  func.func @transform_6(%arg0: i32) -> (i32, i32, i32) {
    %c0_i32 = arith.constant 0 : i32
    %c0_i32_0 = arith.constant 0 : i32
    %c0_i32_1 = arith.constant 0 : i32
    %c0_i32_2 = arith.constant 0 : i32
    return %c0_i32, %c0_i32_0, %c0_i32_1 : i32, i32, i32
  }
  func.func @transform_7(%arg0: i32) -> (i32, i32) {
    %c0_i32 = arith.constant 0 : i32
    %c0_i32_0 = arith.constant 0 : i32
    %c0_i32_1 = arith.constant 0 : i32
    return %c0_i32, %c0_i32_0 : i32, i32
  }
  func.func @transform_8(%arg0: i32) -> (i32, i32) {
    %c0_i32 = arith.constant 0 : i32
    %c0_i32_0 = arith.constant 0 : i32
    return %arg0, %c0_i32 : i32, i32
  }
}

</mosaic_0001>

<bundles_post_ra>
// kernel: tpu_custom_call.1
= control target key start
LH: loop header
LB: loop body
LE: loop exit
PB: predicated region body
PF: predicated region fallthrough
CT: control target
= control target key end

     0   :  { %13 = vsyncpa [#allocation3], 0  ;;  %s2914_s0 = inlined_call_operand.hbm [shape: f32[8,128], index: 0, kind: input, shape index: {}]   ;;  %s2915_s1 = inlined_call_operand.hbm [shape: f32[128,128], index: 1, kind: input, shape index: {}]   ;;  %s2916_s2 = inlined_call_operand.vmem [shape: f32[2,128], index: 2, kind: input, shape index: {}]   ;;  %s2917_s3 = inlined_call_operand.vmem [shape: f32[2,128], index: 3, kind: input, shape index: {}]   ;;  %s2918_s4 = inlined_call_operand.hbm [shape: bf16[2,128,512], index: 4, kind: input, shape index: {}]   ;;  %s2919_s5 = inlined_call_operand.vmem [shape: f32[2,512], index: 5, kind: input, shape index: {}]   ;;  %s2920_s6 = inlined_call_operand.hbm [shape: bf16[2,512,128], index: 6, kind: input, shape index: {}]   ;;  %s2921_s7 = inlined_call_operand.vmem [shape: f32[2,128], index: 7, kind: input, shape index: {}]   ;;  %s2922_s8 = inlined_call_operand.hbm [shape: f32[8,128], index: 8, kind: output, shape index: {}]  }
   0x1   :  { %14 = vsyncpa [#allocation6], 0 }
   0x2   :  { %15 = vsyncpa [#allocation9], 0 }
   0x3   :  { %16 = vsyncpa [#allocation4], 0  ;;  %s2641_s27 = smov [#allocation5]   ;;  %s2523_s9 = scalar_lea.hbm %s2915_s1, 2048 }
   0x4   :  { %s32_s28 = sshll.u32 %s2641_s27, 4  ;;  %p2524_p0 = scmp.ne.s32.totalorder %s2915_s1, %s2523_s9  ;;  %s33_s28 = int_to_ptr.vmem [resolvable:$true] %s32_s28 }
   0x5   :  { %p2527_p1 = scmp.lt.u32.totalorder %s2523_s9, %s2915_s1 }
   0x7   :  { %p2529_p2 = pnand %p2527_p1, %p2524_p0 }
   0x9   :  { %2532 = shalt.err (!%p2529_p2)
}
   0xa   :  { %s2533_s14 = scalar_lea.vmem %s33_s28, 2048  ;;  %p2538_p4 = scmp.lt.s32.totalorder %s33_s28, %s33_s28 }
   0xb   :  { %p2534_p3 = scmp.ne.s32.totalorder %s33_s28, %s2533_s14  ;;  %p2539_p5 = scmp.lt.s32.totalorder %s2533_s14, %s2533_s14 }
   0xd   :  { %p2540_p6 = por %p2539_p5, %p2538_p4 }
   0xf   :  { %p2541_p7 = pnand %p2540_p6, %p2534_p3 }
  0x11   :  { %2544 = shalt.err (!%p2541_p7)
}
  0x12   :  { %s2642_s15 = smov 128   ;;  %s2643_s16 = smov 8  }
  0x13   :  { %38 = dma.hbm_to_vmem [thread:$0]  %s2915_s1, 2048, %s33_s28, [#allocation6], %s2642_s15, %s2642_s15, %s2643_s16  }
  0x14   :  { %s2644_s19 = smov [#allocation2]   ;;  %s2645_s21 = smov [#allocation7]  }
  0x15   :  { %s23_s20 = sshll.u32 %s2644_s19, 4  ;;  %s48_s22 = sshll.u32 %s2645_s21, 4  ;;  %s24_s20 = int_to_ptr.vmem [resolvable:$true] %s23_s20  ;;  %s49_s22 = int_to_ptr.vmem [resolvable:$true] %s48_s22 }
  0x16   :  { %s2545_s25 = scalar_lea.hbm %s2914_s0, 128 }
  0x17   :  { %p2546_p8 = scmp.ne.s32.totalorder %s2914_s0, %s2545_s25  ;;  %p2549_p9 = scmp.lt.u32.totalorder %s2545_s25, %s2914_s0 }
  0x19   :  { %p2551_p10 = pnand %p2549_p9, %p2546_p8 }
  0x1b   :  { %2554 = shalt.err (!%p2551_p10)
}
  0x1c   :  { %s2555_s1 = scalar_lea.vmem %s24_s20, 128  ;;  %p2560_p12 = scmp.lt.s32.totalorder %s24_s20, %s24_s20 }
  0x1d   :  { %p2556_p11 = scmp.ne.s32.totalorder %s24_s20, %s2555_s1  ;;  %p2561_p13 = scmp.lt.s32.totalorder %s2555_s1, %s2555_s1 }
  0x1f   :  { %p2562_p0 = por %p2561_p13, %p2560_p12 }
  0x21   :  { %p2563_p1 = pnand %p2562_p0, %p2556_p11 }
  0x23   :  { %2566 = shalt.err (!%p2563_p1)
}
  0x24   :  { %26 = dma.hbm_to_vmem [thread:$0]  %s2914_s0, 128, %s24_s20, [#allocation3]  }
  0x25   :  { %s2567_s12 = scalar_lea.hbm %s2918_s4, 8192 }
  0x26   :  { %p2568_p2 = scmp.ne.s32.totalorder %s2918_s4, %s2567_s12  ;;  %p2571_p3 = scmp.lt.u32.totalorder %s2567_s12, %s2918_s4 }
  0x28   :  { %p2573_p4 = pnand %p2571_p3, %p2568_p2 }
  0x2a   :  { %2576 = shalt.err (!%p2573_p4)
}
  0x2b   :  { %s2577_s17 = scalar_lea.vmem %s49_s22, 8192  ;;  %p2582_p6 = scmp.lt.s32.totalorder %s49_s22, %s49_s22 }
  0x2c   :  { %p2578_p5 = scmp.ne.s32.totalorder %s49_s22, %s2577_s17  ;;  %p2583_p7 = scmp.lt.s32.totalorder %s2577_s17, %s2577_s17 }
  0x2e   :  { %p2584_p8 = por %p2583_p7, %p2582_p6 }
  0x30   :  { %p2585_p9 = pnand %p2584_p8, %p2578_p5 }
  0x32   :  { %2588 = shalt.err (!%p2585_p9)
}
  0x33   :  { %s2646_s0 = smov 256   ;;  %s2647_s18 = smov 16  }
  0x34   :  { %54 = dma.hbm_to_vmem [thread:$0]  %s2918_s4, 8192, %s49_s22, [#allocation6], %s2646_s0, %s2646_s0, %s2647_s18  }
  0x35   :  { %s2648_s21 = smov [#allocation8]   ;;  %s2589_s26 = scalar_lea.hbm %s2920_s6, 8192 }
  0x36   :  { %s62_s23 = sshll.u32 %s2648_s21, 4  ;;  %p2590_p10 = scmp.ne.s32.totalorder %s2920_s6, %s2589_s26  ;;  %s63_s23 = int_to_ptr.vmem [resolvable:$true] %s62_s23 }
  0x37   :  { %p2593_p11 = scmp.lt.u32.totalorder %s2589_s26, %s2920_s6 }
  0x39   :  { %p2595_p12 = pnand %p2593_p11, %p2590_p10 }
  0x3b   :  { %2598 = shalt.err (!%p2595_p12)
}
  0x3c   :  { %s2599_s28 = scalar_lea.vmem %s63_s23, 8192  ;;  %p2604_p0 = scmp.lt.s32.totalorder %s63_s23, %s63_s23 }
  0x3d   :  { %p2600_p13 = scmp.ne.s32.totalorder %s63_s23, %s2599_s28  ;;  %p2605_p1 = scmp.lt.s32.totalorder %s2599_s28, %s2599_s28 }
  0x3f   :  { %p2606_p2 = por %p2605_p1, %p2604_p0 }
  0x41   :  { %p2607_p3 = pnand %p2606_p2, %p2600_p13 }
  0x43   :  { %2610 = shalt.err (!%p2607_p3)
}
  0x44   :  { %s2649_s4 = smov 64   ;;  %s2650_s22 = smov 4  }
  0x45   :  { %68 = dma.hbm_to_vmem [thread:$0]  %s2920_s6, 8192, %s63_s23, [#allocation9], %s2649_s4, %s2649_s4, %s2650_s22  }
  0x46   :  { %2633 = dma.done.wait [#allocation3], 128  }
  0x47   :  { %2634 = vsyncadd [#allocation3], 4294967168 }
  0x48   :  { %2635 = dma.done.wait [#allocation6], 10240  }
  0x49   :  { %2636 = vsyncadd [#allocation6], 4294957056 }
  0x4a   :  { %2637 = dma.done.wait [#allocation9], 8192  }
  0x4b   :  { %2638 = vsyncadd [#allocation9], 4294959104  ;;  %v2651_v0 = vmov 0.0|0.0   ;;  %vm2652_vm0 = vmmov 0   ;;  %v2653_v1 = vmov 0.0   ;;  %v86_v2 = vld [vmem:[#allocation5] sm:$0xff] }
  0x4c   :  { %2216 = vmatprep.subr.bf16.mxu0 %v2651_v0  ;;  %2108 = vmatprep.mubr.msk.f32.mxu0 %vm2652_vm0, %v2653_v1  ;;  %v87_v3 = vld [vmem:[#allocation5 + $0x8] sm:$0xff]  ;;  %v88_v4 = vld [vmem:[#allocation5 + $0x10] sm:$0xff]  ;;  %v89_v6 = vld [vmem:[#allocation5 + $0x18] sm:$0xff]  ;;  %v2654_v58 = vmov 0   ;;  %s2655_s23 = smov [#allocation10]  }
  0x4d   :  { %2240 = vmatprep.subr.bf16.mxu1 %v2651_v0  ;;  %2143 = vmatprep.mubr.msk.f32.mxu1 %vm2652_vm0, %v2653_v1  ;;  %v2755_v5 = vpack.c.bf16 %v87_v3, %v86_v2  ;;  %v2758_v7 = vpack.c.bf16 %v89_v6, %v88_v4  ;;  %v90_v8 = vld [vmem:[#allocation5 + $0x20] sm:$0xff]  ;;  %v91_v9 = vld [vmem:[#allocation5 + $0x28] sm:$0xff]  ;;  %v92_v10 = vld [vmem:[#allocation5 + $0x30] sm:$0xff]  ;;  %s1766_s24 = sshll.u32 %s2655_s23, 4  ;;  %s1767_s24 = int_to_ptr.vmem [resolvable:$true] %s1766_s24 }
  0x4e   :  { %v93_v11 = vld [vmem:[#allocation5 + $0x38] sm:$0xff]  ;;  %v2764_v12 = vpack.c.bf16 %v91_v9, %v90_v8  ;;  %v94_v13 = vld [vmem:[#allocation5 + $0x40] sm:$0xff]  ;;  %v95_v14 = vld [vmem:[#allocation5 + $0x48] sm:$0xff]  ;;  %s2611_s25 = scalar_lea.vmem %s1767_s24, 128  ;;  %p2616_p5 = scmp.lt.s32.totalorder %s1767_s24, %s1767_s24 }
  0x4f   :  { %2218 = vmatpush3.bf16.msra.mxu0 %v2755_v5  ;;  %2242 = vmatpush3.bf16.msra.mxu1 %v2755_v5  ;;  %v84_v15 = vld [vmem:[#allocation2] sm:$0xff]  ;;  %v2770_v16 = vpack.c.bf16 %v93_v11, %v92_v10  ;;  %v96_v17 = vld [vmem:[#allocation5 + $0x50] sm:$0xff]  ;;  %v2776_v19 = vpack.c.bf16 %v95_v14, %v94_v13  ;;  %v98_v21 = vld [vmem:[#allocation5 + $0x60] sm:$0xff]  ;;  %p2612_p4 = scmp.ne.s32.totalorder %s1767_s24, %s2611_s25  ;;  %p2617_p6 = scmp.lt.s32.totalorder %s2611_s25, %s2611_s25 }
  0x50   :  { %2219 = vmatprep.subr.bf16.mxu0 %v2651_v0  ;;  %2243 = vmatprep.subr.bf16.mxu1 %v2651_v0  ;;  %v97_v18 = vld [vmem:[#allocation5 + $0x58] sm:$0xff]  ;;  %v2778_v20 = vadd.f32 0.1, %v84_v15  ;;  %v99_v22 = vld [vmem:[#allocation5 + $0x68] sm:$0xff]  ;;  %v100_v24 = vld [vmem:[#allocation5 + $0x70] sm:$0xff] }
  0x51   :  { %v2784_v23 = vpack.c.bf16 %v97_v18, %v96_v17  ;;  %v101_v25 = vld [vmem:[#allocation5 + $0x78] sm:$0xff]  ;;  %v2790_v26 = vpack.c.bf16 %v99_v22, %v98_v21  ;;  %v2327_v28 = vld [vmem:[#allocation7] ss:$16 sps:$4 sm:$0xff]   ;;  %v2329_v29 = vld [vmem:[#allocation7 + $0x4] ss:$16 sps:$4 sm:$0xff]   ;;  %p2618_p7 = por %p2617_p6, %p2616_p5 }
  0x52   :  { %v2796_v27 = vpack.c.bf16 %v101_v25, %v100_v24  ;;  %v2332_v30 = vld [vmem:[#allocation7 + $0xc] ss:$16 sps:$4 sm:$0xff]   ;;  %v2335_v31 = vld [vmem:[#allocation7 + $0x24] ss:$16 sps:$4 sm:$0xff]   ;;  %v2333_v32 = vld [vmem:[#allocation7 + $0x20] ss:$16 sps:$4 sm:$0xff]  }
  0x53   :  { %2221 = vmatpush3.bf16.msra.mxu0 %v2758_v7  ;;  %2245 = vmatpush3.bf16.msra.mxu1 %v2758_v7  ;;  %v2341_v33 = vld [vmem:[#allocation7 + $0x44] ss:$16 sps:$4 sm:$0xff]   ;;  %v2339_v34 = vld [vmem:[#allocation7 + $0x40] ss:$16 sps:$4 sm:$0xff]   ;;  %v2330_v38 = vld [vmem:[#allocation7 + $0x8] ss:$16 sps:$4 sm:$0xff]   ;;  %p2619_p8 = pnand %p2618_p7, %p2612_p4 }
  0x54   :  { %2222 = vmatprep.subr.bf16.mxu0 %v2651_v0  ;;  %2246 = vmatprep.subr.bf16.mxu1 %v2651_v0  ;;  %v2338_v40 = vld [vmem:[#allocation7 + $0x2c] ss:$16 sps:$4 sm:$0xff]   ;;  %v2336_v41 = vld [vmem:[#allocation7 + $0x28] ss:$16 sps:$4 sm:$0xff]   ;;  %v2347_v44 = vld [vmem:[#allocation7 + $0x64] ss:$16 sps:$4 sm:$0xff]  }
  0x55   :  { %v2344_v42 = vld [vmem:[#allocation7 + $0x4c] ss:$16 sps:$4 sm:$0xff]   ;;  %v2342_v43 = vld [vmem:[#allocation7 + $0x48] ss:$16 sps:$4 sm:$0xff]   ;;  %v2345_v46 = vld [vmem:[#allocation7 + $0x60] ss:$16 sps:$4 sm:$0xff]  }
  0x56   :  { %v2350_v45 = vld [vmem:[#allocation7 + $0x6c] ss:$16 sps:$4 sm:$0xff]   ;;  %v2348_v47 = vld [vmem:[#allocation7 + $0x68] ss:$16 sps:$4 sm:$0xff]   ;;  %v2351_v48 = vld [vmem:[#allocation7 + $0x80] ss:$16 sps:$4 sm:$0xff]  }
  0x57   :  { %2224 = vmatpush3.bf16.msra.mxu0 %v2764_v12  ;;  %2248 = vmatpush3.bf16.msra.mxu1 %v2764_v12  ;;  %v2353_v49 = vld [vmem:[#allocation7 + $0x84] ss:$16 sps:$4 sm:$0xff]   ;;  %v2354_v50 = vld [vmem:[#allocation7 + $0x88] ss:$16 sps:$4 sm:$0xff]   ;;  %v2356_v51 = vld [vmem:[#allocation7 + $0x8c] ss:$16 sps:$4 sm:$0xff]  }
  0x58   :  { %2225 = vmatprep.subr.bf16.mxu0 %v2651_v0  ;;  %2249 = vmatprep.subr.bf16.mxu1 %v2651_v0  ;;  %v2359_v52 = vld [vmem:[#allocation7 + $0xa4] ss:$16 sps:$4 sm:$0xff]   ;;  %v2362_v53 = vld [vmem:[#allocation7 + $0xac] ss:$16 sps:$4 sm:$0xff]   ;;  %v2357_v54 = vld [vmem:[#allocation7 + $0xa0] ss:$16 sps:$4 sm:$0xff]  }
  0x59   :  { %v2360_v55 = vld [vmem:[#allocation7 + $0xa8] ss:$16 sps:$4 sm:$0xff]   ;;  %v2365_v56 = vld [vmem:[#allocation7 + $0xc4] ss:$16 sps:$4 sm:$0xff]   ;;  %v2368_v57 = vld [vmem:[#allocation7 + $0xcc] ss:$16 sps:$4 sm:$0xff]  }
  0x5a   :  { %v2363_v59 = vld [vmem:[#allocation7 + $0xc0] ss:$16 sps:$4 sm:$0xff]   ;;  %v2366_v60 = vld [vmem:[#allocation7 + $0xc8] ss:$16 sps:$4 sm:$0xff]   ;;  %v2371_v61 = vld [vmem:[#allocation7 + $0xe4] ss:$16 sps:$4 sm:$0xff]  }
  0x5b   :  { %2227 = vmatpush3.bf16.msra.mxu0 %v2770_v16  ;;  %2251 = vmatpush3.bf16.msra.mxu1 %v2770_v16  ;;  %v2374_v62 = vld [vmem:[#allocation7 + $0xec] ss:$16 sps:$4 sm:$0xff]   ;;  %v2369_v63 = vld [vmem:[#allocation7 + $0xe0] ss:$16 sps:$4 sm:$0xff]   ;;  %v2372_v2 = vld [vmem:[#allocation7 + $0xe8] ss:$16 sps:$4 sm:$0xff]  }
  0x5c   :  { %2228 = vmatprep.subr.bf16.mxu0 %v2651_v0  ;;  %2252 = vmatprep.subr.bf16.mxu1 %v2651_v0  ;;  %v1777_v9 = vld [vmem:[%s2916_s2] ss:$0 sm:$0xff]  ;;  %v2375_v17 = vld [vmem:[#allocation8 + $0x40] sm:$0xff]   ;;  %v2379_v24 = vld [vmem:[#allocation8 + $0x48] sm:$0xff]  }
  0x5d   :  { %v1778_v11 = vld [vmem:[%s2917_s3] ss:$0 sm:$0xff]  ;;  %v2376_v18 = vld [vmem:[#allocation8 + $0xc0] sm:$0xff]   ;;  %v2380_v25 = vld [vmem:[#allocation8 + $0xc8] sm:$0xff]  }
  0x5e   :  { %v2377_v21 = vld [vmem:[#allocation8] sm:$0xff]  }
  0x5f   :  { %2230 = vmatpush3.bf16.msra.mxu0 %v2776_v19  ;;  %2254 = vmatpush3.bf16.msra.mxu1 %v2776_v19  ;;  %v2378_v22 = vld [vmem:[#allocation8 + $0x80] sm:$0xff]  }
  0x60   :  { %2231 = vmatprep.subr.bf16.mxu0 %v2651_v0  ;;  %2255 = vmatprep.subr.bf16.mxu1 %v2651_v0 }
  0x63   :  { %2233 = vmatpush3.bf16.msra.mxu0 %v2784_v23  ;;  %2257 = vmatpush3.bf16.msra.mxu1 %v2784_v23 }
  0x64   :  { %2234 = vmatprep.subr.bf16.mxu0 %v2651_v0  ;;  %2258 = vmatprep.subr.bf16.mxu1 %v2651_v0 }
  0x67   :  { %2236 = vmatpush3.bf16.msra.mxu0 %v2790_v26  ;;  %2260 = vmatpush3.bf16.msra.mxu1 %v2790_v26 }
  0x68   :  { %2237 = vmatprep.subr.bf16.mxu0 %v2651_v0  ;;  %2261 = vmatprep.subr.bf16.mxu1 %v2651_v0 }
  0x6b   :  { %2239 = vmatpush3.bf16.msra.mxu0 %v2796_v27  ;;  %2263 = vmatpush3.bf16.msra.mxu1 %v2796_v27 }
  0x6c   :  { %473 = vmatprep.subr.bf16.mxu0 %v2329_v29  ;;  %514 = vmatprep.subr.bf16.mxu1 %v2332_v30  ;;  %v2382_v29 = vld [vmem:[#allocation8 + $0x88] sm:$0xff]   ;;  %v2383_v30 = vld [vmem:[#allocation8 + $0x50] sm:$0xff]  }
  0x6e   :  { %2109 = vmatmul.mubr.f32.vlgmr.msra.gmra.mrb[0].mxu0 %v2778_v20 }
  0x6f   :  { %474 = vmatpush1.bf16.msra.mxu0 %v2327_v28  ;;  %505 = vmatprep.mubr.bf16.mxu0 %v2654_v58  ;;  %v2381_v28 = vld [vmem:[#allocation8 + $0x8] sm:$0xff]  }
  0x70   :  { %475 = vmatprep.subr.bf16.mxu0 %v2335_v31  ;;  %v2384_v31 = vld [vmem:[#allocation8 + $0xd0] sm:$0xff]  }
  0x73   :  { %476 = vmatpush1.bf16.msra.mxu0 %v2333_v32  ;;  %v2385_v32 = vld [vmem:[#allocation8 + $0x10] sm:$0xff]  }
  0x74   :  { %477 = vmatprep.subr.bf16.mxu0 %v2341_v33  ;;  %v2386_v33 = vld [vmem:[#allocation8 + $0x90] sm:$0xff]  }
  0x77   :  { %478 = vmatpush1.bf16.msra.mxu0 %v2339_v34  ;;  %v2387_v34 = vld [vmem:[#allocation8 + $0x58] sm:$0xff]  }
  0x78   :  { %479 = vmatprep.subr.bf16.mxu0 %v2347_v44  ;;  %v2397_v44 = vld [vmem:[#allocation8 + $0x28] sm:$0xff]  }
  0x7b   :  { %480 = vmatpush1.bf16.msra.mxu0 %v2345_v46  ;;  %v2399_v46 = vld [vmem:[#allocation8 + $0x70] sm:$0xff]  }
  0x7c   :  { %481 = vmatprep.subr.bf16.mxu0 %v2353_v49  ;;  %v2402_v49 = vld [vmem:[#allocation8 + $0xb0] sm:$0xff]  }
  0x7f   :  { %482 = vmatpush1.bf16.msra.mxu0 %v2351_v48  ;;  %v2401_v48 = vld [vmem:[#allocation8 + $0x30] sm:$0xff]  }
  0x80   :  { %483 = vmatprep.subr.bf16.mxu0 %v2359_v52  ;;  %v2405_v52 = vld [vmem:[#allocation8 + $0x38] sm:$0xff]  }
  0x83   :  { %484 = vmatpush1.bf16.msra.mxu0 %v2357_v54  ;;  %v293_v54 = vlaneseq }
  0x84   :  { %485 = vmatprep.subr.bf16.mxu0 %v2365_v56 }
  0x87   :  { %486 = vmatpush1.bf16.msra.mxu0 %v2363_v59  ;;  %v291_v59 = vld [vmem:[%s2919_s5] ss:$2 sm:$0xf] }
  0x88   :  { %487 = vmatprep.subr.bf16.mxu0 %v2371_v61 }
  0x8b   :  { %488 = vmatpush1.bf16.msra.mxu0 %v2369_v63 }
  0x8c   :  { %1954 = vmatprep.subr.bf16.mxu0 %v2375_v17 }
 0x141   :  { %v168_v35 = vpop.f32.mrb[0].mxu0 }
 0x142   :  { %v2805_v36 = vsub.f32 %v2778_v20, %v168_v35  ;;  %v2110_v37 = vpop.f32.mrb[1].mxu0  ;;  %v2388_v35 = vld [vmem:[#allocation8 + $0xd8] sm:$0xff]  }
 0x143   :  { %v2390_v37 = vld [vmem:[#allocation8 + $0x98] sm:$0xff]  }
 0x144   :  { %v173_v39 = vmul.f32 %v2805_v36, %v2805_v36 }
 0x146   :  { %2144 = vmatmul.mubr.f32.vlgmr.msra.gmra.mrb[0].mxu1 %v173_v39  ;;  %v2392_v39 = vld [vmem:[#allocation8 + $0xe0] sm:$0xff]  }
 0x147   :  { %515 = vmatpush1.bf16.msra.mxu1 %v2330_v38  ;;  %546 = vmatprep.mubr.bf16.mxu1 %v2654_v58  ;;  %v2391_v38 = vld [vmem:[#allocation8 + $0x60] sm:$0xff]  }
 0x148   :  { %516 = vmatprep.subr.bf16.mxu1 %v2338_v40  ;;  %v2393_v40 = vld [vmem:[#allocation8 + $0x20] sm:$0xff]  }
 0x14b   :  { %517 = vmatpush1.bf16.msra.mxu1 %v2336_v41  ;;  %v2394_v41 = vld [vmem:[#allocation8 + $0xa0] sm:$0xff]  }
 0x14c   :  { %518 = vmatprep.subr.bf16.mxu1 %v2344_v42  ;;  %v2395_v42 = vld [vmem:[#allocation8 + $0x68] sm:$0xff]  }
 0x14f   :  { %519 = vmatpush1.bf16.msra.mxu1 %v2342_v43  ;;  %v2396_v43 = vld [vmem:[#allocation8 + $0xe8] sm:$0xff]  }
 0x150   :  { %520 = vmatprep.subr.bf16.mxu1 %v2350_v45  ;;  %v2398_v45 = vld [vmem:[#allocation8 + $0xa8] sm:$0xff]  }
 0x153   :  { %521 = vmatpush1.bf16.msra.mxu1 %v2348_v47  ;;  %v2400_v47 = vld [vmem:[#allocation8 + $0xf0] sm:$0xff]  }
 0x154   :  { %522 = vmatprep.subr.bf16.mxu1 %v2356_v51  ;;  %v2404_v51 = vld [vmem:[#allocation8 + $0xf8] sm:$0xff]  }
 0x157   :  { %523 = vmatpush1.bf16.msra.mxu1 %v2354_v50  ;;  %v2403_v50 = vld [vmem:[#allocation8 + $0x78] sm:$0xff]  }
 0x158   :  { %524 = vmatprep.subr.bf16.mxu1 %v2362_v53  ;;  %v2406_v53 = vld [vmem:[#allocation8 + $0xb8] sm:$0xff]  }
 0x15b   :  { %525 = vmatpush1.bf16.msra.mxu1 %v2360_v55  ;;  %v2820_v55 = vshrl.u32 %v293_v54, 7  ;;  %v2409_v54 = vld [vmem:[#allocation7 + $0x104] ss:$16 sps:$4 sm:$0xff]  }
 0x15c   :  { %526 = vmatprep.subr.bf16.mxu1 %v2368_v57 }
 0x15d   :  { %v295_v56 = vsub.s32 0, %v2820_v55  ;;  %v303_v57 = vsub.s32 2, %v2820_v55  ;;  %v307_v61 = vsub.s32 3, %v2820_v55 }
 0x15f   :  { %527 = vmatpush1.bf16.msra.mxu1 %v2366_v60  ;;  %v299_v60 = vsub.s32 1, %v2820_v55  ;;  %v304_v63 = vrot.slane %v291_v59, %v303_v57 }
 0x160   :  { %528 = vmatprep.subr.bf16.mxu1 %v2374_v62  ;;  %v296_v62 = vrot.slane %v291_v59, %v295_v56 }
 0x163   :  { %529 = vmatpush1.bf16.msra.mxu1 %v2372_v2  ;;  %v300_v2 = vrot.slane %v291_v59, %v299_v60 }
 0x164   :  { %1976 = vmatprep.subr.bf16.mxu1 %v2376_v18 }
 0x219   :  { %v240_v3 = vpop.f32.mrb[0].mxu1 }
 0x21a   :  { %v241_v4 = vadd.f32 1e-05, %v240_v3  ;;  %v2145_v6 = vpop.f32.mrb[1].mxu1  ;;  %v308_v3 = vrot.slane %v291_v59, %v307_v61  ;;  %v2412_v59 = vld [vmem:[#allocation7 + $0x10c] ss:$16 sps:$4 sm:$0xff]  }
 0x21c   :  { %2487 = vrsqrt.f32 %v241_v4 }
 0x226   :  { %v2488_v8 = vpop.eup %2487 }
 0x227   :  { %v245_v10 = vmul.f32 %v2488_v8, %v2805_v36  ;;  %v2389_v36 = vld [vmem:[#allocation8 + $0x18] sm:$0xff]  }
 0x229   :  { %v251_v13 = vmul.f32 %v1777_v9, %v245_v10 }
 0x22b   :  { %v257_v14 = vadd.f32 %v1778_v11, %v251_v13 }
 0x22d   :  { %v258_v15 = vpack.c.bf16 %v257_v14, %v257_v14 }
 0x22f   :  { %506 = vmatmul.mubr.bf16.vlgmr.msra.gmra.mrb[4].mxu0 %v258_v15  ;;  %547 = vmatmul.mubr.bf16.vlgmr.msra.gmra.mrb[4].mxu1 %v258_v15 }
 0x230   :  { %1955 = vmatpush3.bf16.msra.mxu0 %v2377_v21  ;;  %1977 = vmatpush3.bf16.msra.mxu1 %v2378_v22 }
 0x231   :  { %1956 = vmatprep.subr.bf16.mxu0 %v2379_v24  ;;  %1978 = vmatprep.subr.bf16.mxu1 %v2380_v25 }
 0x234   :  { %1957 = vmatpush3.bf16.msra.mxu0 %v2381_v28  ;;  %1979 = vmatpush3.bf16.msra.mxu1 %v2382_v29 }
 0x235   :  { %1958 = vmatprep.subr.bf16.mxu0 %v2383_v30  ;;  %1980 = vmatprep.subr.bf16.mxu1 %v2384_v31 }
 0x238   :  { %1959 = vmatpush3.bf16.msra.mxu0 %v2385_v32  ;;  %1981 = vmatpush3.bf16.msra.mxu1 %v2386_v33 }
 0x239   :  { %1960 = vmatprep.subr.bf16.mxu0 %v2387_v34  ;;  %1982 = vmatprep.subr.bf16.mxu1 %v2388_v35 }
 0x23c   :  { %1961 = vmatpush3.bf16.msra.mxu0 %v2389_v36  ;;  %1983 = vmatpush3.bf16.msra.mxu1 %v2390_v37 }
 0x23d   :  { %1962 = vmatprep.subr.bf16.mxu0 %v2391_v38  ;;  %1984 = vmatprep.subr.bf16.mxu1 %v2392_v39 }
 0x240   :  { %1963 = vmatpush3.bf16.msra.mxu0 %v2393_v40  ;;  %1985 = vmatpush3.bf16.msra.mxu1 %v2394_v41 }
 0x241   :  { %1964 = vmatprep.subr.bf16.mxu0 %v2395_v42  ;;  %1986 = vmatprep.subr.bf16.mxu1 %v2396_v43 }
 0x244   :  { %1965 = vmatpush3.bf16.msra.mxu0 %v2397_v44  ;;  %1987 = vmatpush3.bf16.msra.mxu1 %v2398_v45 }
 0x245   :  { %1966 = vmatprep.subr.bf16.mxu0 %v2399_v46  ;;  %1988 = vmatprep.subr.bf16.mxu1 %v2400_v47 }
 0x248   :  { %1967 = vmatpush3.bf16.msra.mxu0 %v2401_v48  ;;  %1989 = vmatpush3.bf16.msra.mxu1 %v2402_v49 }
 0x249   :  { %1968 = vmatprep.subr.bf16.mxu0 %v2403_v50  ;;  %1990 = vmatprep.subr.bf16.mxu1 %v2404_v51 }
 0x24c   :  { %1969 = vmatpush3.bf16.msra.mxu0 %v2405_v52  ;;  %1991 = vmatpush3.bf16.msra.mxu1 %v2406_v53 }
 0x24d   :  { %2264 = vmatprep.subr.bf16.mxu0 %v2651_v0  ;;  %2288 = vmatprep.subr.bf16.mxu1 %v2651_v0 }
 0x302   :  { %v507_v4 = vpop.f32.mrb[4].mxu0  ;;  %v548_v6 = vpop.f32.mrb[4].mxu1 }
 0x303   :  { %v508_v8 = vadd.f32 %v507_v4, %v296_v62  ;;  %v549_v9 = vadd.f32 %v548_v6, %v304_v63  ;;  %v509_v10 = vpop.f32.mrb[5].mxu0  ;;  %v550_v11 = vpop.f32.mrb[5].mxu1  ;;  %v2415_v62 = vld [vmem:[#allocation7 + $0x124] ss:$16 sps:$4 sm:$0xff]   ;;  %v2413_v63 = vld [vmem:[#allocation7 + $0x120] ss:$16 sps:$4 sm:$0xff]  }
 0x304   :  { %v510_v13 = vadd.f32 %v509_v10, %v300_v2  ;;  %v551_v14 = vadd.f32 %v550_v11, %v308_v3  ;;  %v511_v15 = vpop.f32.mrb[6].mxu0  ;;  %v552_v17 = vpop.f32.mrb[6].mxu1  ;;  %v2421_v2 = vld [vmem:[#allocation7 + $0x144] ss:$16 sps:$4 sm:$0xff]   ;;  %v2419_v3 = vld [vmem:[#allocation7 + $0x140] ss:$16 sps:$4 sm:$0xff]  }
 0x305   :  { %v1811_v18 = vmul.f32 -1.442695, %v508_v8  ;;  %v1813_v21 = vmul.f32 -1.442695, %v549_v9  ;;  %v512_v22 = vpop.f32.mrb[7].mxu0  ;;  %v553_v24 = vpop.f32.mrb[7].mxu1 }
 0x306   :  { %v1812_v25 = vmul.f32 -1.442695, %v510_v13  ;;  %v1814_v28 = vmul.f32 -1.442695, %v551_v14  ;;  %v2418_v10 = vld [vmem:[#allocation7 + $0x12c] ss:$16 sps:$4 sm:$0xff]  }
 0x307   :  { %2489 = vpow2.f32 %v1811_v18  ;;  %v2416_v11 = vld [vmem:[#allocation7 + $0x128] ss:$16 sps:$4 sm:$0xff]   ;;  %v2427_v15 = vld [vmem:[#allocation7 + $0x164] ss:$16 sps:$4 sm:$0xff]   ;;  %v2430_v17 = vld [vmem:[#allocation7 + $0x16c] ss:$16 sps:$4 sm:$0xff]  }
 0x308   :  { %2491 = vpow2.f32 %v1813_v21  ;;  %v2425_v18 = vld [vmem:[#allocation7 + $0x160] ss:$16 sps:$4 sm:$0xff]   ;;  %v2428_v21 = vld [vmem:[#allocation7 + $0x168] ss:$16 sps:$4 sm:$0xff]   ;;  %v2433_v22 = vld [vmem:[#allocation7 + $0x184] ss:$16 sps:$4 sm:$0xff]  }
 0x309   :  { %2493 = vpow2.f32 %v1812_v25  ;;  %v2431_v24 = vld [vmem:[#allocation7 + $0x180] ss:$16 sps:$4 sm:$0xff]   ;;  %v2434_v25 = vld [vmem:[#allocation7 + $0x188] ss:$16 sps:$4 sm:$0xff]  }
 0x30a   :  { %2495 = vpow2.f32 %v1814_v28  ;;  %v2436_v28 = vld [vmem:[#allocation7 + $0x18c] ss:$16 sps:$4 sm:$0xff]  }
 0x311   :  { %v2490_v29 = vpop.eup %2489 }
 0x312   :  { %v2492_v30 = vpop.eup %2491  ;;  %v567_v31 = vadd.f32 1.0, %v2490_v29  ;;  %v2442_v29 = vld [vmem:[#allocation7 + $0x1ac] ss:$16 sps:$4 sm:$0xff]  }
 0x313   :  { %v2494_v32 = vpop.eup %2493  ;;  %v569_v33 = vadd.f32 1.0, %v2492_v30  ;;  %v2437_v30 = vld [vmem:[#allocation7 + $0x1a0] ss:$16 sps:$4 sm:$0xff]  }
 0x314   :  { %v2496_v34 = vpop.eup %2495  ;;  %2497 = vrcp.f32 %v567_v31  ;;  %v568_v35 = vadd.f32 1.0, %v2494_v32  ;;  %v2440_v31 = vld [vmem:[#allocation7 + $0x1a8] ss:$16 sps:$4 sm:$0xff]   ;;  %v2445_v32 = vld [vmem:[#allocation7 + $0x1c4] ss:$16 sps:$4 sm:$0xff]  }
 0x315   :  { %2499 = vrcp.f32 %v569_v33  ;;  %v570_v36 = vadd.f32 1.0, %v2496_v34  ;;  %v2448_v33 = vld [vmem:[#allocation7 + $0x1cc] ss:$16 sps:$4 sm:$0xff]   ;;  %v2443_v34 = vld [vmem:[#allocation7 + $0x1c0] ss:$16 sps:$4 sm:$0xff]  }
 0x316   :  { %2501 = vrcp.f32 %v568_v35  ;;  %v2446_v35 = vld [vmem:[#allocation7 + $0x1c8] ss:$16 sps:$4 sm:$0xff]  }
 0x317   :  { %2503 = vrcp.f32 %v570_v36  ;;  %v2451_v36 = vld [vmem:[#allocation7 + $0x1e4] ss:$16 sps:$4 sm:$0xff]  }
 0x31e   :  { %v2498_v37 = vpop.eup %2497 }
 0x31f   :  { %v2500_v38 = vpop.eup %2499  ;;  %v579_v40 = vmul.f32 %v2498_v37, %v508_v8  ;;  %v2410_v8 = vld [vmem:[#allocation7 + $0x108] ss:$16 sps:$4 sm:$0xff]   ;;  %v2454_v37 = vld [vmem:[#allocation7 + $0x1ec] ss:$16 sps:$4 sm:$0xff]  }
 0x320   :  { %v2502_v39 = vpop.eup %2501  ;;  %v581_v42 = vmul.f32 %v2500_v38, %v549_v9  ;;  %v2449_v38 = vld [vmem:[#allocation7 + $0x1e0] ss:$16 sps:$4 sm:$0xff]  }
 0x321   :  { %v2504_v41 = vpop.eup %2503  ;;  %v580_v43 = vmul.f32 %v2502_v39, %v510_v13  ;;  %v583_v46 = vpack.c.bf16 %v579_v40, %v579_v40  ;;  %v2424_v13 = vld [vmem:[#allocation7 + $0x14c] ss:$16 sps:$4 sm:$0xff]   ;;  %v2452_v39 = vld [vmem:[#allocation7 + $0x1e8] ss:$16 sps:$4 sm:$0xff]  }
 0x322   :  { %v582_v44 = vmul.f32 %v2504_v41, %v551_v14  ;;  %v585_v48 = vpack.c.bf16 %v581_v42, %v581_v42  ;;  %v2422_v14 = vld [vmem:[#allocation7 + $0x148] ss:$16 sps:$4 sm:$0xff]  }
 0x323   :  { %v584_v45 = vpack.c.bf16 %v580_v43, %v580_v43 }
 0x324   :  { %v586_v47 = vpack.c.bf16 %v582_v44, %v582_v44  ;;  %v1848_v44 = vld [vmem:[%s2916_s2 + $0x1] ss:$0 sm:$0xff] }
 0x325   :  { %880 = vmatprep.mubr.bf16.mxu0 %v584_v45 }
 0x326   :  { %920 = vmatprep.mubr.bf16.mxu1 %v586_v47  ;;  %881 = vmatmul.mubr.bf16.vlgmr.msra.gmra.mrb[8].mxu0 %v583_v46  ;;  %v1849_v46 = vld [vmem:[%s2917_s3 + $0x1] ss:$0 sm:$0xff] }
 0x327   :  { %921 = vmatmul.mubr.bf16.vlgmr.msra.gmra.mrb[8].mxu1 %v585_v48  ;;  %2266 = vmatpush3.bf16.msra.mxu0 %v2755_v5 }
 0x328   :  { %2267 = vmatprep.subr.bf16.mxu0 %v2651_v0  ;;  %2178 = vmatprep.mubr.msk.f32.mxu0 %vm2652_vm0, %v2653_v1 }
 0x329   :  { %2290 = vmatpush3.bf16.msra.mxu1 %v2755_v5  ;;  %2213 = vmatprep.mubr.msk.f32.mxu1 %vm2652_vm0, %v2653_v1 }
 0x32a   :  { %2291 = vmatprep.subr.bf16.mxu1 %v2651_v0 }
 0x32b   :  { %2269 = vmatpush3.bf16.msra.mxu0 %v2758_v7 }
 0x32c   :  { %2270 = vmatprep.subr.bf16.mxu0 %v2651_v0 }
 0x32d   :  { %2293 = vmatpush3.bf16.msra.mxu1 %v2758_v7  ;;  %v1815_v7 = vld [vmem:[%s2921_s7] ss:$0 sm:$0xff] }
 0x32e   :  { %2294 = vmatprep.subr.bf16.mxu1 %v2651_v0 }
 0x32f   :  { %2272 = vmatpush3.bf16.msra.mxu0 %v2764_v12 }
 0x330   :  { %2273 = vmatprep.subr.bf16.mxu0 %v2651_v0 }
 0x331   :  { %2296 = vmatpush3.bf16.msra.mxu1 %v2764_v12 }
 0x332   :  { %2297 = vmatprep.subr.bf16.mxu1 %v2651_v0 }
 0x333   :  { %2275 = vmatpush3.bf16.msra.mxu0 %v2770_v16 }
 0x334   :  { %2276 = vmatprep.subr.bf16.mxu0 %v2651_v0 }
 0x335   :  { %2299 = vmatpush3.bf16.msra.mxu1 %v2770_v16 }
 0x336   :  { %2300 = vmatprep.subr.bf16.mxu1 %v2651_v0 }
 0x337   :  { %2278 = vmatpush3.bf16.msra.mxu0 %v2776_v19 }
 0x338   :  { %2279 = vmatprep.subr.bf16.mxu0 %v2651_v0 }
 0x339   :  { %2302 = vmatpush3.bf16.msra.mxu1 %v2776_v19 }
 0x33a   :  { %2303 = vmatprep.subr.bf16.mxu1 %v2651_v0 }
 0x33b   :  { %2281 = vmatpush3.bf16.msra.mxu0 %v2784_v23 }
 0x33c   :  { %2282 = vmatprep.subr.bf16.mxu0 %v2651_v0 }
 0x33d   :  { %2305 = vmatpush3.bf16.msra.mxu1 %v2784_v23 }
 0x33e   :  { %2306 = vmatprep.subr.bf16.mxu1 %v2651_v0 }
 0x33f   :  { %2284 = vmatpush3.bf16.msra.mxu0 %v2790_v26 }
 0x340   :  { %2285 = vmatprep.subr.bf16.mxu0 %v2651_v0 }
 0x341   :  { %2308 = vmatpush3.bf16.msra.mxu1 %v2790_v26 }
 0x342   :  { %2309 = vmatprep.subr.bf16.mxu1 %v2651_v0 }
 0x343   :  { %2287 = vmatpush3.bf16.msra.mxu0 %v2796_v27 }
 0x344   :  { %1302 = vmatprep.subr.bf16.mxu0 %v2409_v54  ;;  %v2468_v54 = vld [vmem:[#allocation8 + $0x1d8] sm:$0xff]  }
 0x345   :  { %2311 = vmatpush3.bf16.msra.mxu1 %v2796_v27  ;;  %v2407_v27 = vld [vmem:[#allocation7 + $0x100] ss:$16 sps:$4 sm:$0xff]  }
 0x346   :  { %1343 = vmatprep.subr.bf16.mxu1 %v2412_v59  ;;  %v2469_v59 = vld [vmem:[#allocation8 + $0x118] sm:$0xff]  }
 0x3f9   :  { %v1970_v1 = vpop.f32.mrb[8].mxu0 }
 0x3fa   :  { %v1992_v5 = vpop.f32.mrb[8].mxu1  ;;  %v1971_v12 = vpop.f32.mrb[9].mxu0 }
 0x3fb   :  { %v1972_v16 = vadd.f32 %v1971_v12, %v1970_v1  ;;  %v1993_v19 = vpop.f32.mrb[9].mxu1  ;;  %v1973_v23 = vpop.f32.mrb[10].mxu0  ;;  %v2457_v12 = vld [vmem:[#allocation8 + $0x100] sm:$0xff]  }
 0x3fc   :  { %v1994_v49 = vadd.f32 %v1993_v19, %v1992_v5  ;;  %v1995_v50 = vpop.f32.mrb[10].mxu1  ;;  %v1974_v51 = vpop.f32.mrb[11].mxu0  ;;  %v2455_v5 = vld [vmem:[#allocation8 + $0x140] sm:$0xff]   ;;  %v2459_v19 = vld [vmem:[#allocation8 + $0x148] sm:$0xff]  }
 0x3fd   :  { %v883_v26 = vadd.f32 %v1972_v16, %v1815_v7  ;;  %v1996_v52 = vpop.f32.mrb[11].mxu1  ;;  %v2456_v7 = vld [vmem:[#allocation8 + $0x1c0] sm:$0xff]   ;;  %v2460_v23 = vld [vmem:[#allocation8 + $0x1c8] sm:$0xff]   ;;  %v2463_v51 = vld [vmem:[#allocation8 + $0x150] sm:$0xff]  }
 0x3fe   :  { %v2458_v16 = vld [vmem:[#allocation8 + $0x180] sm:$0xff]   ;;  %v2462_v50 = vld [vmem:[#allocation8 + $0x188] sm:$0xff]   ;;  %v2465_v52 = vld [vmem:[#allocation8 + $0x110] sm:$0xff]  }
 0x3ff   :  { %v923_v0 = vadd.f32 %v1994_v49, %v883_v26  ;;  %v2461_v49 = vld [vmem:[#allocation8 + $0x108] sm:$0xff]   ;;  %v2464_v26 = vld [vmem:[#allocation8 + $0x1d0] sm:$0xff]  }
 0x401   :  { %v2875_v53 = vadd.f32 %v923_v0, %v2778_v20  ;;  %v2466_v0 = vld [vmem:[#allocation8 + $0x190] sm:$0xff]  }
 0x403   :  { %2179 = vmatmul.mubr.f32.vlgmr.msra.gmra.mrb[2].mxu0 %v2875_v53 }
 0x404   :  { %1334 = vmatprep.mubr.bf16.mxu0 %v2654_v58  ;;  %1303 = vmatpush1.bf16.msra.mxu0 %v2407_v27  ;;  %v2467_v27 = vld [vmem:[#allocation8 + $0x158] sm:$0xff]  }
 0x405   :  { %1304 = vmatprep.subr.bf16.mxu0 %v2415_v62  ;;  %v2470_v62 = vld [vmem:[#allocation8 + $0x198] sm:$0xff]  }
 0x408   :  { %1305 = vmatpush1.bf16.msra.mxu0 %v2413_v63  ;;  %v2471_v63 = vld [vmem:[#allocation8 + $0x160] sm:$0xff]  }
 0x409   :  { %1306 = vmatprep.subr.bf16.mxu0 %v2421_v2  ;;  %v2472_v2 = vld [vmem:[#allocation8 + $0x1e0] sm:$0xff]  }
 0x40c   :  { %1307 = vmatpush1.bf16.msra.mxu0 %v2419_v3  ;;  %v2473_v3 = vld [vmem:[#allocation8 + $0x120] sm:$0xff]  }
 0x40d   :  { %1308 = vmatprep.subr.bf16.mxu0 %v2427_v15  ;;  %v2483_v15 = vld [vmem:[#allocation8 + $0x178] sm:$0xff]  }
 0x410   :  { %1309 = vmatpush1.bf16.msra.mxu0 %v2425_v18  ;;  %v2485_v18 = vld [vmem:[#allocation8 + $0x138] sm:$0xff]  }
 0x411   :  { %1310 = vmatprep.subr.bf16.mxu0 %v2433_v22  ;;  %v1850_v22 = vld [vmem:[%s2919_s5 + $0x1] ss:$2 sm:$0xf] }
 0x414   :  { %1311 = vmatpush1.bf16.msra.mxu0 %v2431_v24  ;;  %v1125_v24 = vrot.slane %v1850_v22, %v295_v56 }
 0x4d6   :  { %v995_v20 = vpop.f32.mrb[2].mxu0 }
 0x4d7   :  { %v999_v4 = vsub.f32 %v2875_v53, %v995_v20  ;;  %v2180_v6 = vpop.f32.mrb[3].mxu0  ;;  %v2474_v20 = vld [vmem:[#allocation8 + $0x1a0] sm:$0xff]  }
 0x4d8   :  { %v2476_v6 = vld [vmem:[#allocation8 + $0x1e8] sm:$0xff]  }
 0x4d9   :  { %v1000_v9 = vmul.f32 %v999_v4, %v999_v4 }
 0x4db   :  { %2214 = vmatmul.mubr.f32.vlgmr.msra.gmra.mrb[2].mxu1 %v1000_v9  ;;  %v2478_v9 = vld [vmem:[#allocation8 + $0x1a8] sm:$0xff]  }
 0x4dc   :  { %1344 = vmatpush1.bf16.msra.mxu1 %v2410_v8  ;;  %1375 = vmatprep.mubr.bf16.mxu1 %v2654_v58  ;;  %v2439_v58 = vld [vmem:[#allocation7 + $0x1a4] ss:$16 sps:$4 sm:$0xff]   ;;  %v2477_v8 = vld [vmem:[#allocation8 + $0x128] sm:$0xff]  }
 0x4dd   :  { %1345 = vmatprep.subr.bf16.mxu1 %v2418_v10  ;;  %1312 = vmatprep.subr.bf16.mxu0 %v2439_v58  ;;  %v2479_v10 = vld [vmem:[#allocation8 + $0x170] sm:$0xff]   ;;  %v1137_v58 = vrot.slane %v1850_v22, %v307_v61 }
 0x4de   :  { %1313 = vmatpush1.bf16.msra.mxu0 %v2437_v30 }
 0x4df   :  { %1314 = vmatprep.subr.bf16.mxu0 %v2445_v32 }
 0x4e0   :  { %1346 = vmatpush1.bf16.msra.mxu1 %v2416_v11  ;;  %v2480_v11 = vld [vmem:[#allocation8 + $0x1f0] sm:$0xff]  }
 0x4e1   :  { %1347 = vmatprep.subr.bf16.mxu1 %v2424_v13  ;;  %v2481_v13 = vld [vmem:[#allocation8 + $0x130] sm:$0xff]  }
 0x4e2   :  { %1315 = vmatpush1.bf16.msra.mxu0 %v2443_v34 }
 0x4e3   :  { %1316 = vmatprep.subr.bf16.mxu0 %v2451_v36 }
 0x4e4   :  { %1348 = vmatpush1.bf16.msra.mxu1 %v2422_v14  ;;  %v2482_v14 = vld [vmem:[#allocation8 + $0x1b0] sm:$0xff]  }
 0x4e5   :  { %1349 = vmatprep.subr.bf16.mxu1 %v2430_v17  ;;  %v2484_v17 = vld [vmem:[#allocation8 + $0x1f8] sm:$0xff]  }
 0x4e6   :  { %1317 = vmatpush1.bf16.msra.mxu0 %v2449_v38 }
 0x4e7   :  { %2032 = vmatprep.subr.bf16.mxu0 %v2455_v5 }
 0x4e8   :  { %1350 = vmatpush1.bf16.msra.mxu1 %v2428_v21  ;;  %v2486_v21 = vld [vmem:[#allocation8 + $0x1b8] sm:$0xff]  }
 0x4e9   :  { %1351 = vmatprep.subr.bf16.mxu1 %v2436_v28  ;;  %v1129_v28 = vrot.slane %v1850_v22, %v299_v60 }
 0x4ec   :  { %1352 = vmatpush1.bf16.msra.mxu1 %v2434_v25  ;;  %v1133_v25 = vrot.slane %v1850_v22, %v303_v57 }
 0x4ed   :  { %1353 = vmatprep.subr.bf16.mxu1 %v2442_v29 }
 0x4f0   :  { %1354 = vmatpush1.bf16.msra.mxu1 %v2440_v31 }
 0x4f1   :  { %1355 = vmatprep.subr.bf16.mxu1 %v2448_v33 }
 0x4f4   :  { %1356 = vmatpush1.bf16.msra.mxu1 %v2446_v35 }
 0x4f5   :  { %1357 = vmatprep.subr.bf16.mxu1 %v2454_v37 }
 0x4f8   :  { %1358 = vmatpush1.bf16.msra.mxu1 %v2452_v39 }
 0x4f9   :  { %2054 = vmatprep.subr.bf16.mxu1 %v2456_v7 }
 0x5ae   :  { %v1067_v40 = vpop.f32.mrb[2].mxu1 }
 0x5af   :  { %v1068_v41 = vadd.f32 1e-05, %v1067_v40  ;;  %v2215_v42 = vpop.f32.mrb[3].mxu1 }
 0x5b1   :  { %2505 = vrsqrt.f32 %v1068_v41 }
 0x5bb   :  { %v2506_v43 = vpop.eup %2505 }
 0x5bc   :  { %v1072_v45 = vmul.f32 %v2506_v43, %v999_v4  ;;  %v2475_v4 = vld [vmem:[#allocation8 + $0x168] sm:$0xff]  }
 0x5be   :  { %v1078_v47 = vmul.f32 %v1848_v44, %v1072_v45 }
 0x5c0   :  { %v1084_v48 = vadd.f32 %v1849_v46, %v1078_v47 }
 0x5c2   :  { %v1085_v1 = vpack.c.bf16 %v1084_v48, %v1084_v48 }
 0x5c4   :  { %1335 = vmatmul.mubr.bf16.vlgmr.msra.gmra.mrb[12].mxu0 %v1085_v1  ;;  %1376 = vmatmul.mubr.bf16.vlgmr.msra.gmra.mrb[12].mxu1 %v1085_v1 }
 0x5c5   :  { %2033 = vmatpush3.bf16.msra.mxu0 %v2457_v12  ;;  %2055 = vmatpush3.bf16.msra.mxu1 %v2458_v16 }
 0x5c6   :  { %2034 = vmatprep.subr.bf16.mxu0 %v2459_v19  ;;  %2056 = vmatprep.subr.bf16.mxu1 %v2460_v23 }
 0x5c9   :  { %2035 = vmatpush3.bf16.msra.mxu0 %v2461_v49  ;;  %2057 = vmatpush3.bf16.msra.mxu1 %v2462_v50 }
 0x5ca   :  { %2036 = vmatprep.subr.bf16.mxu0 %v2463_v51  ;;  %2058 = vmatprep.subr.bf16.mxu1 %v2464_v26 }
 0x5cd   :  { %2037 = vmatpush3.bf16.msra.mxu0 %v2465_v52  ;;  %2059 = vmatpush3.bf16.msra.mxu1 %v2466_v0 }
 0x5ce   :  { %2038 = vmatprep.subr.bf16.mxu0 %v2467_v27  ;;  %2060 = vmatprep.subr.bf16.mxu1 %v2468_v54  ;;  %v1887_v27 = vld [vmem:[%s2921_s7 + $0x1] ss:$0 sm:$0xff] }
 0x5d1   :  { %2039 = vmatpush3.bf16.msra.mxu0 %v2469_v59  ;;  %2061 = vmatpush3.bf16.msra.mxu1 %v2470_v62 }
 0x5d2   :  { %2040 = vmatprep.subr.bf16.mxu0 %v2471_v63  ;;  %2062 = vmatprep.subr.bf16.mxu1 %v2472_v2 }
 0x5d5   :  { %2041 = vmatpush3.bf16.msra.mxu0 %v2473_v3  ;;  %2063 = vmatpush3.bf16.msra.mxu1 %v2474_v20 }
 0x5d6   :  { %2042 = vmatprep.subr.bf16.mxu0 %v2475_v4  ;;  %2064 = vmatprep.subr.bf16.mxu1 %v2476_v6 }
 0x5d9   :  { %2043 = vmatpush3.bf16.msra.mxu0 %v2477_v8  ;;  %2065 = vmatpush3.bf16.msra.mxu1 %v2478_v9 }
 0x5da   :  { %2044 = vmatprep.subr.bf16.mxu0 %v2479_v10  ;;  %2066 = vmatprep.subr.bf16.mxu1 %v2480_v11 }
 0x5dd   :  { %2045 = vmatpush3.bf16.msra.mxu0 %v2481_v13  ;;  %2067 = vmatpush3.bf16.msra.mxu1 %v2482_v14 }
 0x5de   :  { %2046 = vmatprep.subr.bf16.mxu0 %v2483_v15  ;;  %2068 = vmatprep.subr.bf16.mxu1 %v2484_v17 }
 0x5e1   :  { %2047 = vmatpush3.bf16.msra.mxu0 %v2485_v18  ;;  %2069 = vmatpush3.bf16.msra.mxu1 %v2486_v21 }
 0x697   :  { %v1336_v29 = vpop.f32.mrb[12].mxu0  ;;  %v1377_v30 = vpop.f32.mrb[12].mxu1 }
 0x698   :  { %v1337_v31 = vadd.f32 %v1336_v29, %v1125_v24  ;;  %v1378_v32 = vadd.f32 %v1377_v30, %v1133_v25  ;;  %v1338_v33 = vpop.f32.mrb[13].mxu0  ;;  %v1379_v34 = vpop.f32.mrb[13].mxu1 }
 0x699   :  { %v1339_v35 = vadd.f32 %v1338_v33, %v1129_v28  ;;  %v1380_v36 = vadd.f32 %v1379_v34, %v1137_v58  ;;  %v1340_v37 = vpop.f32.mrb[14].mxu0  ;;  %v1381_v38 = vpop.f32.mrb[14].mxu1 }
 0x69a   :  { %v1883_v56 = vmul.f32 -1.442695, %v1337_v31  ;;  %v1885_v39 = vmul.f32 -1.442695, %v1378_v32  ;;  %v1341_v40 = vpop.f32.mrb[15].mxu0  ;;  %v1382_v57 = vpop.f32.mrb[15].mxu1 }
 0x69b   :  { %v1884_v41 = vmul.f32 -1.442695, %v1339_v35  ;;  %v1886_v42 = vmul.f32 -1.442695, %v1380_v36 }
 0x69c   :  { %2507 = vpow2.f32 %v1883_v56 }
 0x69d   :  { %2509 = vpow2.f32 %v1885_v39 }
 0x69e   :  { %2511 = vpow2.f32 %v1884_v41 }
 0x69f   :  { %2513 = vpow2.f32 %v1886_v42 }
 0x6a6   :  { %v2508_v55 = vpop.eup %2507 }
 0x6a7   :  { %v2510_v60 = vpop.eup %2509  ;;  %v1396_v61 = vadd.f32 1.0, %v2508_v55 }
 0x6a8   :  { %v2512_v43 = vpop.eup %2511  ;;  %v1398_v44 = vadd.f32 1.0, %v2510_v60 }
 0x6a9   :  { %v2514_v45 = vpop.eup %2513  ;;  %2515 = vrcp.f32 %v1396_v61  ;;  %v1397_v46 = vadd.f32 1.0, %v2512_v43 }
 0x6aa   :  { %2517 = vrcp.f32 %v1398_v44  ;;  %v1399_v47 = vadd.f32 1.0, %v2514_v45 }
 0x6ab   :  { %2519 = vrcp.f32 %v1397_v46 }
 0x6ac   :  { %2521 = vrcp.f32 %v1399_v47 }
 0x6b3   :  { %v2516_v48 = vpop.eup %2515 }
 0x6b4   :  { %v2518_v1 = vpop.eup %2517  ;;  %v1408_v7 = vmul.f32 %v2516_v48, %v1337_v31 }
 0x6b5   :  { %v2520_v5 = vpop.eup %2519  ;;  %v1410_v16 = vmul.f32 %v2518_v1, %v1378_v32 }
 0x6b6   :  { %v2522_v12 = vpop.eup %2521  ;;  %v1409_v19 = vmul.f32 %v2520_v5, %v1339_v35  ;;  %v1412_v50 = vpack.c.bf16 %v1408_v7, %v1408_v7 }
 0x6b7   :  { %v1411_v23 = vmul.f32 %v2522_v12, %v1380_v36  ;;  %v1414_v26 = vpack.c.bf16 %v1410_v16, %v1410_v16 }
 0x6b8   :  { %v1413_v49 = vpack.c.bf16 %v1409_v19, %v1409_v19 }
 0x6b9   :  { %v1415_v51 = vpack.c.bf16 %v1411_v23, %v1411_v23 }
 0x6ba   :  { %1710 = vmatprep.mubr.bf16.mxu0 %v1413_v49 }
 0x6bb   :  { %1750 = vmatprep.mubr.bf16.mxu1 %v1415_v51  ;;  %1711 = vmatmul.mubr.bf16.vlgmr.msra.gmra.mrb[16].mxu0 %v1412_v50 }
 0x6bc   :  { %1751 = vmatmul.mubr.bf16.vlgmr.msra.gmra.mrb[16].mxu1 %v1414_v26 }
 0x78e   :  { %v2048_v52 = vpop.f32.mrb[16].mxu0 }
 0x78f   :  { %v2070_v0 = vpop.f32.mrb[16].mxu1  ;;  %v2049_v54 = vpop.f32.mrb[17].mxu0 }
 0x790   :  { %v2050_v59 = vadd.f32 %v2049_v54, %v2048_v52  ;;  %v2071_v62 = vpop.f32.mrb[17].mxu1  ;;  %v2051_v63 = vpop.f32.mrb[18].mxu0 }
 0x791   :  { %v2072_v2 = vadd.f32 %v2071_v62, %v2070_v0  ;;  %v2073_v3 = vpop.f32.mrb[18].mxu1  ;;  %v2052_v20 = vpop.f32.mrb[19].mxu0 }
 0x792   :  { %v1713_v4 = vadd.f32 %v2050_v59, %v1887_v27  ;;  %v2074_v6 = vpop.f32.mrb[19].mxu1 }
 0x794   :  { %v1753_v8 = vadd.f32 %v2072_v2, %v1713_v4 }
 0x796   :  { %v1758_v9 = vadd.f32 %v1753_v8, %v2875_v53 }
 0x798   :  { %1759 = vst [vmem:[#allocation10] sm:$0xff] %v1758_v9 }
 0x799   :  { %2622 = shalt.err (!%p2619_p8)
}
 0x79a   :  { %s2623_s27 = scalar_lea.hbm %s2922_s8, 128 }
 0x79b   :  { %p2624_p9 = scmp.ne.s32.totalorder %s2922_s8, %s2623_s27  ;;  %p2627_p10 = scmp.lt.u32.totalorder %s2623_s27, %s2922_s8 }
 0x79d   :  { %p2629_p11 = pnand %p2627_p10, %p2624_p9 }
 0x79f   :  { %2632 = shalt.err (!%p2629_p11)
}
 0x7a0   :  { %1769 = dma.vmem_to_hbm [thread:$0]  %s1767_s24, 128, %s2922_s8, [#allocation4]  }
 0x7a1   :  { %2639 = dma.done.wait [#allocation4], 128  }
 0x7a2   :  { %2640 = vsyncadd [#allocation4], 4294967168 }
 0x7a3   :  { %1773 = vsyncpa [#allocation3], 1 }
 0x7a4   :  { %1774 = vsyncpa [#allocation6], 1 }
 0x7a5   :  { %1775 = vsyncpa [#allocation9], 1 }
 0x7a6   :  { %1776 = vsyncpa [#allocation4], 1 }

</bundles_post_ra>
